<compile_context>
chip_gen: v6e
topology: v6e:2x2x1
jax: 0.10.0
libtpu: 0.0.40
codegen_flags: <defaults>
</compile_context>

<pallas_src>
import math
import jax
import jax.numpy as jnp
from jax.experimental import pallas as pl
from jax.experimental.pallas import tpu as pltpu


def gru_cell_kernel(x_ref, h_ref, wih_ref, whh_ref, b_ref, o_ref):
    f32 = jnp.float32
    x = x_ref[...]                      # (tm, I), native dtype for the MXU
    h = h_ref[...]                      # (tm, H), native dtype for the MXU
    h32 = h.astype(f32)

    # Packed biases (4, H), f32:
    #   row 0: b_ir + b_hr, row 1: b_iz + b_hz, row 2: b_in, row 3: b_hn
    b_r = b_ref[0:1, :]
    b_z = b_ref[1:2, :]
    b_in = b_ref[2:3, :]
    b_hn = b_ref[3:4, :]

    # Per-gate matmuls; no lane-axis slicing of a (tm, 3H) result, so odd H
    # never crosses (8, 128) vreg tiles and the output store stays dense.
    r = jax.nn.sigmoid(
        jnp.dot(x, wih_ref[0], preferred_element_type=f32)
        + jnp.dot(h, whh_ref[0], preferred_element_type=f32)
        + b_r)
    z = jax.nn.sigmoid(
        jnp.dot(x, wih_ref[1], preferred_element_type=f32)
        + jnp.dot(h, whh_ref[1], preferred_element_type=f32)
        + b_z)
    n = jnp.tanh(
        jnp.dot(x, wih_ref[2], preferred_element_type=f32) + b_in
        + r * (jnp.dot(h, whh_ref[2], preferred_element_type=f32) + b_hn))

    o_ref[...] = ((1.0 - z) * n + z * h32).astype(o_ref.dtype)


def gru_cell(x, h, weight_ih, weight_hh, bias_ih, bias_hh, *, block_m=256):
    """x: (B, I), h: (B, H), weight_ih: (3H, I), weight_hh: (3H, H),
    bias_ih/bias_hh: (3H,).  Returns h': (B, H) with h.dtype."""
    B, I = x.shape
    B2, H = h.shape
    assert B == B2, "batch mismatch between x and h"

    # ---- wrapper-side layout glue (pure reshapes/transposes, done once) ----
    # Per-gate weight slabs so the kernel does (tm,I)@(I,H) / (tm,H)@(H,H).
    wih = weight_ih.reshape(3, H, I).transpose(0, 2, 1)    # (3, I, H)
    whh = weight_hh.reshape(3, H, H).transpose(0, 2, 1)    # (3, H, H)

    b_ih = bias_ih.astype(jnp.float32)
    b_hh = bias_hh.astype(jnp.float32)
    b_packed = jnp.stack(
        [b_ih[0:H] + b_hh[0:H],            # r gate: biases fused
         b_ih[H:2 * H] + b_hh[H:2 * H],    # z gate: biases fused
         b_ih[2 * H:3 * H],                # n gate: input bias
         b_hh[2 * H:3 * H]],               # n gate: hidden bias (inside r*(...))
        axis=0)                            # (4, H) f32

    # Batch tile: full batch if it fits one tile, otherwise 256-row tiles
    # (multiple of 8 sublanes; fills the MXU M dimension on v6e/v7x).
    tm = B if B <= block_m else block_m
    grid = (pl.cdiv(B, tm),)

    # VMEM budget: resident weights + double-buffered activation tiles + f32
    # gate intermediates, with 2x headroom, capped well below physical VMEM.
    def _nbytes(a):
        return a.size * jnp.dtype(a.dtype).itemsize

    est = (_nbytes(wih) + _nbytes(whh) + _nbytes(b_packed)
           + 2 * (tm * I * jnp.dtype(x.dtype).itemsize
                  + 2 * tm * H * jnp.dtype(h.dtype).itemsize)
           + 10 * tm * H * 4)
    vmem_limit = int(max(32 * 2**20, min(96 * 2**20, 2 * est)))
    # TODO(synk): for H/I large enough that the resident weights exceed ~40 MiB
    # (v7x's 64 MiB VMEM), tile the per-gate N / K axes with an f32 accumulator
    # instead of keeping all six weight matrices resident.

    grid_spec = pltpu.PrefetchScalarGridSpec(
        num_scalar_prefetch=0,
        grid=grid,
        in_specs=[
            pl.BlockSpec((tm, I), lambda i: (i, 0)),        # x tile
            pl.BlockSpec((tm, H), lambda i: (i, 0)),        # h tile
            pl.BlockSpec((3, I, H), lambda i: (0, 0, 0)),   # W_ih (resident)
            pl.BlockSpec((3, H, H), lambda i: (0, 0, 0)),   # W_hh (resident)
            pl.BlockSpec((4, H), lambda i: (0, 0)),         # biases (resident)
        ],
        out_specs=pl.BlockSpec((tm, H), lambda i: (i, 0)),
    )

    # TODO(synk): when driving this cell inside a time loop, add
    # input_output_aliases={1: 0} (h in -> h' out) and hoist the weight DMAs
    # across a time grid axis so weights stream from HBM once per sequence.
    return pl.pallas_call(
        gru_cell_kernel,
        out_shape=jax.ShapeDtypeStruct((B, H), h.dtype),
        grid_spec=grid_spec,
        compiler_params=pltpu.CompilerParams(
            dimension_semantics=("parallel",),
            vmem_limit_bytes=vmem_limit,
        ),
    )(x, h, wih, whh, b_packed)


def gru_cell_ref(x, h, weight_ih, weight_hh, bias_ih, bias_hh):
    """Pure-JAX reference (mirrors PyTorch GRUCell) for correctness checking."""
    H = h.shape[1]
    gi = x @ weight_ih.T + bias_ih
    gh = h @ weight_hh.T + bias_hh
    i_r, i_z, i_n = gi[:, :H], gi[:, H:2 * H], gi[:, 2 * H:]
    h_r, h_z, h_n = gh[:, :H], gh[:, H:2 * H], gh[:, 2 * H:]
    r = jax.nn.sigmoid(i_r + h_r)
    z = jax.nn.sigmoid(i_z + h_z)
    n = jnp.tanh(i_n + r * h_n)
    return (1.0 - z) * n + z * h


if __name__ == "__main__":
    batch = 8
    input_size = 16
    hidden_size = 32
    dtype = jnp.float32

    key = jax.random.PRNGKey(0)
    kx, kh, kwih, kwhh, kbih, kbhh = jax.random.split(key, 6)

    # Deterministic init matching PyTorch reset_parameters():
    # uniform(-stdv, stdv) with stdv = 1/sqrt(hidden_size).
    stdv = 1.0 / math.sqrt(hidden_size)
    weight_ih = jax.random.uniform(kwih, (3 * hidden_size, input_size),
                                   minval=-stdv, maxval=stdv, dtype=dtype)
    weight_hh = jax.random.uniform(kwhh, (3 * hidden_size, hidden_size),
                                   minval=-stdv, maxval=stdv, dtype=dtype)
    bias_ih = jax.random.uniform(kbih, (3 * hidden_size,),
                                 minval=-stdv, maxval=stdv, dtype=dtype)
    bias_hh = jax.random.uniform(kbhh, (3 * hidden_size,),
                                 minval=-stdv, maxval=stdv, dtype=dtype)

    x = jax.random.normal(kx, (batch, input_size), dtype=dtype)
    h = jax.random.normal(kh, (batch, hidden_size), dtype=dtype)

    # Reference first (kernel output is compared against it).
    h_ref = gru_cell_ref(x, h, weight_ih, weight_hh, bias_ih, bias_hh)

    h_new = gru_cell(x, h, weight_ih, weight_hh, bias_ih, bias_hh)
    h_new = jax.block_until_ready(h_new)

    assert h_new.shape == (batch, hidden_size)
    assert h_new.dtype == h.dtype
    assert jnp.allclose(h_new, h_ref, atol=1e-5, rtol=1e-5)

    print("KERNEL_OK")
</pallas_src>

<mosaic_0001>
module attributes {stable_mosaic.version = 11 : i64} {
  func.func @gru_cell_kernel(%arg0: i32, %arg1: memref<8x16xf32, #tpu.memory_space<vmem>>, %arg2: memref<8x32xf32, #tpu.memory_space<vmem>>, %arg3: memref<3x16x32xf32, #tpu.memory_space<vmem>>, %arg4: memref<3x32x32xf32, #tpu.memory_space<vmem>>, %arg5: memref<4x32xf32, #tpu.memory_space<vmem>>, %arg6: memref<8x32xf32, #tpu.memory_space<vmem>>) attributes {dimension_semantics = [#tpu.dimension_semantics<parallel>], iteration_bounds = array<i64: 1>, scalar_prefetch = 0 : i64, scratch_operands = 0 : i64, tpu.core_type = #tpu.core_type<tc>, window_params = [{transform_indices = @transform_0, window_bounds = array<i64: 8, 16>}, {transform_indices = @transform_1, window_bounds = array<i64: 8, 32>}, {pipeline_mode = #tpu.pipeline_mode<synchronous>, transform_indices = @transform_2, window_bounds = array<i64: 3, 16, 32>}, {pipeline_mode = #tpu.pipeline_mode<synchronous>, transform_indices = @transform_3, window_bounds = array<i64: 3, 32, 32>}, {pipeline_mode = #tpu.pipeline_mode<synchronous>, transform_indices = @transform_4, window_bounds = array<i64: 4, 32>}, {transform_indices = @transform_5, window_bounds = array<i64: 8, 32>}]} {
    %c0 = arith.constant 0 : index
    %c0_0 = arith.constant 0 : index
    %0 = vector.load %arg1[%c0, %c0_0] : memref<8x16xf32, #tpu.memory_space<vmem>>, vector<8x16xf32>
    %c0_1 = arith.constant 0 : index
    %c0_2 = arith.constant 0 : index
    %1 = vector.load %arg2[%c0_1, %c0_2] : memref<8x32xf32, #tpu.memory_space<vmem>>, vector<8x32xf32>
    %c0_3 = arith.constant 0 : index
    %c0_4 = arith.constant 0 : index
    %2 = vector.load %arg5[%c0_3, %c0_4] : memref<4x32xf32, #tpu.memory_space<vmem>>, vector<1x32xf32>
    %c1 = arith.constant 1 : index
    %c0_5 = arith.constant 0 : index
    %3 = vector.load %arg5[%c1, %c0_5] : memref<4x32xf32, #tpu.memory_space<vmem>>, vector<1x32xf32>
    %c2 = arith.constant 2 : index
    %c0_6 = arith.constant 0 : index
    %4 = vector.load %arg5[%c2, %c0_6] : memref<4x32xf32, #tpu.memory_space<vmem>>, vector<1x32xf32>
    %c3 = arith.constant 3 : index
    %c0_7 = arith.constant 0 : index
    %5 = vector.load %arg5[%c3, %c0_7] : memref<4x32xf32, #tpu.memory_space<vmem>>, vector<1x32xf32>
    %c0_8 = arith.constant 0 : index
    %c0_9 = arith.constant 0 : index
    %c0_10 = arith.constant 0 : index
    %6 = vector.load %arg3[%c0_8, %c0_9, %c0_10] : memref<3x16x32xf32, #tpu.memory_space<vmem>>, vector<1x16x32xf32>
    %7 = vector.shape_cast %6 : vector<1x16x32xf32> to vector<16x32xf32>
    %cst = arith.constant dense<0.000000e+00> : vector<8x32xf32>
    %8 = tpu.matmul %0, %7, %cst {dimension_numbers = #tpu.dot_dimension_numbers<[1], [0], [0], [1], [0, 0, 1, 1], [], []>} : vector<8x16xf32>, vector<16x32xf32>, vector<8x32xf32> -> vector<8x32xf32>
    %c0_11 = arith.constant 0 : index
    %c0_12 = arith.constant 0 : index
    %c0_13 = arith.constant 0 : index
    %9 = vector.load %arg4[%c0_11, %c0_12, %c0_13] : memref<3x32x32xf32, #tpu.memory_space<vmem>>, vector<1x32x32xf32>
    %10 = vector.shape_cast %9 : vector<1x32x32xf32> to vector<32x32xf32>
    %cst_14 = arith.constant dense<0.000000e+00> : vector<8x32xf32>
    %11 = tpu.matmul %1, %10, %cst_14 {dimension_numbers = #tpu.dot_dimension_numbers<[1], [0], [0], [1], [0, 0, 1, 1], [], []>} : vector<8x32xf32>, vector<32x32xf32>, vector<8x32xf32> -> vector<8x32xf32>
    %12 = arith.addf %8, %11 : vector<8x32xf32>
    %13 = vector.broadcast %2 : vector<1x32xf32> to vector<8x32xf32>
    %14 = arith.addf %12, %13 : vector<8x32xf32>
    %15 = arith.negf %14 : vector<8x32xf32>
    %16 = math.exp %15 : vector<8x32xf32>
    %cst_15 = arith.constant 1.000000e+00 : f32
    %17 = vector.broadcast %cst_15 : f32 to vector<8x32xf32>
    %18 = arith.addf %17, %16 : vector<8x32xf32>
    %19 = arith.divf %17, %18 : vector<8x32xf32>
    %c1_16 = arith.constant 1 : index
    %c0_17 = arith.constant 0 : index
    %c0_18 = arith.constant 0 : index
    %20 = vector.load %arg3[%c1_16, %c0_17, %c0_18] : memref<3x16x32xf32, #tpu.memory_space<vmem>>, vector<1x16x32xf32>
    %21 = vector.shape_cast %20 : vector<1x16x32xf32> to vector<16x32xf32>
    %cst_19 = arith.constant dense<0.000000e+00> : vector<8x32xf32>
    %22 = tpu.matmul %0, %21, %cst_19 {dimension_numbers = #tpu.dot_dimension_numbers<[1], [0], [0], [1], [0, 0, 1, 1], [], []>} : vector<8x16xf32>, vector<16x32xf32>, vector<8x32xf32> -> vector<8x32xf32>
    %c1_20 = arith.constant 1 : index
    %c0_21 = arith.constant 0 : index
    %c0_22 = arith.constant 0 : index
    %23 = vector.load %arg4[%c1_20, %c0_21, %c0_22] : memref<3x32x32xf32, #tpu.memory_space<vmem>>, vector<1x32x32xf32>
    %24 = vector.shape_cast %23 : vector<1x32x32xf32> to vector<32x32xf32>
    %cst_23 = arith.constant dense<0.000000e+00> : vector<8x32xf32>
    %25 = tpu.matmul %1, %24, %cst_23 {dimension_numbers = #tpu.dot_dimension_numbers<[1], [0], [0], [1], [0, 0, 1, 1], [], []>} : vector<8x32xf32>, vector<32x32xf32>, vector<8x32xf32> -> vector<8x32xf32>
    %26 = arith.addf %22, %25 : vector<8x32xf32>
    %27 = vector.broadcast %3 : vector<1x32xf32> to vector<8x32xf32>
    %28 = arith.addf %26, %27 : vector<8x32xf32>
    %29 = arith.negf %28 : vector<8x32xf32>
    %30 = math.exp %29 : vector<8x32xf32>
    %cst_24 = arith.constant 1.000000e+00 : f32
    %31 = vector.broadcast %cst_24 : f32 to vector<8x32xf32>
    %32 = arith.addf %31, %30 : vector<8x32xf32>
    %33 = arith.divf %31, %32 : vector<8x32xf32>
    %c2_25 = arith.constant 2 : index
    %c0_26 = arith.constant 0 : index
    %c0_27 = arith.constant 0 : index
    %34 = vector.load %arg3[%c2_25, %c0_26, %c0_27] : memref<3x16x32xf32, #tpu.memory_space<vmem>>, vector<1x16x32xf32>
    %35 = vector.shape_cast %34 : vector<1x16x32xf32> to vector<16x32xf32>
    %cst_28 = arith.constant dense<0.000000e+00> : vector<8x32xf32>
    %36 = tpu.matmul %0, %35, %cst_28 {dimension_numbers = #tpu.dot_dimension_numbers<[1], [0], [0], [1], [0, 0, 1, 1], [], []>} : vector<8x16xf32>, vector<16x32xf32>, vector<8x32xf32> -> vector<8x32xf32>
    %37 = vector.broadcast %4 : vector<1x32xf32> to vector<8x32xf32>
    %38 = arith.addf %36, %37 : vector<8x32xf32>
    %c2_29 = arith.constant 2 : index
    %c0_30 = arith.constant 0 : index
    %c0_31 = arith.constant 0 : index
    %39 = vector.load %arg4[%c2_29, %c0_30, %c0_31] : memref<3x32x32xf32, #tpu.memory_space<vmem>>, vector<1x32x32xf32>
    %40 = vector.shape_cast %39 : vector<1x32x32xf32> to vector<32x32xf32>
    %cst_32 = arith.constant dense<0.000000e+00> : vector<8x32xf32>
    %41 = tpu.matmul %1, %40, %cst_32 {dimension_numbers = #tpu.dot_dimension_numbers<[1], [0], [0], [1], [0, 0, 1, 1], [], []>} : vector<8x32xf32>, vector<32x32xf32>, vector<8x32xf32> -> vector<8x32xf32>
    %42 = vector.broadcast %5 : vector<1x32xf32> to vector<8x32xf32>
    %43 = arith.addf %41, %42 : vector<8x32xf32>
    %44 = arith.mulf %19, %43 : vector<8x32xf32>
    %45 = arith.addf %38, %44 : vector<8x32xf32>
    %46 = math.tanh %45 : vector<8x32xf32>
    %cst_33 = arith.constant 1.000000e+00 : f32
    %47 = vector.broadcast %cst_33 : f32 to vector<8x32xf32>
    %48 = arith.subf %47, %33 : vector<8x32xf32>
    %49 = arith.mulf %48, %46 : vector<8x32xf32>
    %50 = arith.mulf %33, %1 : vector<8x32xf32>
    %51 = arith.addf %49, %50 : vector<8x32xf32>
    %c0_34 = arith.constant 0 : index
    %c0_35 = arith.constant 0 : index
    %52 = vector.load %arg6[%c0_34, %c0_35] : memref<8x32xf32, #tpu.memory_space<vmem>>, vector<8x32xf32>
    tpu.vector_store %arg6[%c0_34, %c0_35], %51 {strides = array<i32>} : memref<8x32xf32, #tpu.memory_space<vmem>>, vector<8x32xf32>,
    return
  }
  func.func @transform_0(%arg0: i32) -> (i32, i32) {
    %c0_i32 = arith.constant 0 : i32
    %c0_i32_0 = arith.constant 0 : i32
    return %arg0, %c0_i32 : i32, i32
  }
  func.func @transform_1(%arg0: i32) -> (i32, i32) {
    %c0_i32 = arith.constant 0 : i32
    %c0_i32_0 = arith.constant 0 : i32
    return %arg0, %c0_i32 : i32, i32
  }
  func.func @transform_2(%arg0: i32) -> (i32, i32, i32) {
    %c0_i32 = arith.constant 0 : i32
    %c0_i32_0 = arith.constant 0 : i32
    %c0_i32_1 = arith.constant 0 : i32
    %c0_i32_2 = arith.constant 0 : i32
    return %c0_i32, %c0_i32_0, %c0_i32_1 : i32, i32, i32
  }
  func.func @transform_3(%arg0: i32) -> (i32, i32, i32) {
    %c0_i32 = arith.constant 0 : i32
    %c0_i32_0 = arith.constant 0 : i32
    %c0_i32_1 = arith.constant 0 : i32
    %c0_i32_2 = arith.constant 0 : i32
    return %c0_i32, %c0_i32_0, %c0_i32_1 : i32, i32, i32
  }
  func.func @transform_4(%arg0: i32) -> (i32, i32) {
    %c0_i32 = arith.constant 0 : i32
    %c0_i32_0 = arith.constant 0 : i32
    %c0_i32_1 = arith.constant 0 : i32
    return %c0_i32, %c0_i32_0 : i32, i32
  }
  func.func @transform_5(%arg0: i32) -> (i32, i32) {
    %c0_i32 = arith.constant 0 : i32
    %c0_i32_0 = arith.constant 0 : i32
    return %arg0, %c0_i32 : i32, i32
  }
}

</mosaic_0001>

<bundles_post_ra>
// kernel: tpu_custom_call.1
= control target key start
LH: loop header
LB: loop body
LE: loop exit
PB: predicated region body
PF: predicated region fallthrough
CT: control target
= control target key end

     0   :  { %10 = vsyncpa [#allocation3], 0  ;;  %s909_s0 = inlined_call_operand.hbm [shape: f32[8,16], index: 0, kind: input, shape index: {}]   ;;  %s910_s1 = inlined_call_operand.hbm [shape: f32[8,32], index: 1, kind: input, shape index: {}]   ;;  %s911_s2 = inlined_call_operand.hbm [shape: f32[3,16,32], index: 2, kind: input, shape index: {}]   ;;  %s912_s3 = inlined_call_operand.hbm [shape: f32[3,32,32], index: 3, kind: input, shape index: {}]   ;;  %s913_s4 = inlined_call_operand.vmem [shape: f32[4,32], index: 4, kind: input, shape index: {}]   ;;  %s914_s5 = inlined_call_operand.hbm [shape: f32[8,32], index: 5, kind: output, shape index: {}]  }
   0x1   :  { %11 = vsyncpa [#allocation6], 0 }
   0x2   :  { %12 = vsyncpa [#allocation9], 0 }
   0x3   :  { %13 = vsyncpa [#allocation4], 0  ;;  %s800_s18 = smov [#allocation5]   ;;  %s801_s20 = smov [#allocation2]  }
   0x4   :  { %s30_s19 = sshll.u32 %s800_s18, 4  ;;  %s20_s21 = sshll.u32 %s801_s20, 4  ;;  %s31_s19 = int_to_ptr.vmem [resolvable:$true] %s30_s19  ;;  %s21_s21 = int_to_ptr.vmem [resolvable:$true] %s20_s21 }
   0x5   :  { %s700_s22 = scalar_lea.vmem %s31_s19, 128  ;;  %p705_p1 = scmp.lt.s32.totalorder %s31_s19, %s31_s19 }
   0x6   :  { %p701_p0 = scmp.ne.s32.totalorder %s31_s19, %s700_s22  ;;  %p706_p2 = scmp.lt.s32.totalorder %s700_s22, %s700_s22 }
   0x8   :  { %p707_p3 = por %p706_p2, %p705_p1 }
   0xa   :  { %p708_p4 = pnand %p707_p3, %p701_p0 }
   0xc   :  { %711 = shalt.err (!%p708_p4)
}
   0xd   :  { %33 = dma.hbm_to_vmem [thread:$0]  %s910_s1, 128, %s31_s19, [#allocation6]  }
   0xe   :  { %s720_s25 = scalar_lea.vmem %s21_s21, 128  ;;  %p725_p6 = scmp.lt.s32.totalorder %s21_s21, %s21_s21 }
   0xf   :  { %p721_p5 = scmp.ne.s32.totalorder %s21_s21, %s720_s25  ;;  %p726_p7 = scmp.lt.s32.totalorder %s720_s25, %s720_s25 }
  0x11   :  { %p727_p8 = por %p726_p7, %p725_p6 }
  0x13   :  { %p728_p9 = pnand %p727_p8, %p721_p5 }
  0x15   :  { %731 = shalt.err (!%p728_p9)
}
  0x16   :  { %23 = dma.hbm_to_vmem [thread:$0]  %s909_s0, 128, %s21_s21, [#allocation3]  }
  0x17   :  { %s802_s28 = smov [#allocation7]  }
  0x18   :  { %s39_s29 = sshll.u32 %s802_s28, 4  ;;  %s40_s29 = int_to_ptr.vmem [resolvable:$true] %s39_s29 }
  0x19   :  { %s740_s30 = scalar_lea.vmem %s40_s29, 768  ;;  %p745_p11 = scmp.lt.s32.totalorder %s40_s29, %s40_s29 }
  0x1a   :  { %p741_p10 = scmp.ne.s32.totalorder %s40_s29, %s740_s30  ;;  %p746_p12 = scmp.lt.s32.totalorder %s740_s30, %s740_s30 }
  0x1c   :  { %p747_p13 = por %p746_p12, %p745_p11 }
  0x1e   :  { %p748_p0 = pnand %p747_p13, %p741_p10 }
  0x20   :  { %751 = shalt.err (!%p748_p0)
}
  0x21   :  { %s803_s1 = smov 128   ;;  %s804_s6 = smov 8  }
  0x22   :  { %45 = dma.hbm_to_vmem [thread:$0]  %s911_s2, 768, %s40_s29, [#allocation6], %s803_s1, %s803_s1, %s804_s6  }
  0x23   :  { %s805_s9 = smov [#allocation8]  }
  0x24   :  { %s51_s10 = sshll.u32 %s805_s9, 4  ;;  %s52_s10 = int_to_ptr.vmem [resolvable:$true] %s51_s10 }
  0x25   :  { %s760_s0 = scalar_lea.vmem %s52_s10, 1536  ;;  %p765_p2 = scmp.lt.s32.totalorder %s52_s10, %s52_s10 }
  0x26   :  { %p761_p1 = scmp.ne.s32.totalorder %s52_s10, %s760_s0  ;;  %p766_p3 = scmp.lt.s32.totalorder %s760_s0, %s760_s0 }
  0x28   :  { %p767_p4 = por %p766_p3, %p765_p2 }
  0x2a   :  { %p768_p5 = pnand %p767_p4, %p761_p1 }
  0x2c   :  { %771 = shalt.err (!%p768_p5)
}
  0x2d   :  { %57 = dma.hbm_to_vmem [thread:$0]  %s912_s3, 1536, %s52_s10, [#allocation9], %s803_s1, %s803_s1, %s804_s6  }
  0x2e   :  { %792 = dma.done.wait [#allocation3], 128  }
  0x2f   :  { %793 = vsyncadd [#allocation3], 4294967168 }
  0x30   :  { %794 = dma.done.wait [#allocation6], 896  }
  0x31   :  { %795 = vsyncadd [#allocation6], 4294966400 }
  0x32   :  { %796 = dma.done.wait [#allocation9], 1536  }
  0x33   :  { %797 = vsyncadd [#allocation9], 4294965760  ;;  %v806_v0 = vmov 0.0   ;;  %vm807_vm0 = vmmov 0   ;;  %v83_v1 = vld [vmem:[#allocation8 + $0x18] sm:$0xff]  ;;  %v82_v2 = vld [vmem:[#allocation8 + $0x10] sm:$0xff] }
  0x34   :  { %619 = vmatprep.subr.mxu0 %v806_v0  ;;  %630 = vmatprep.subr.mxu1 %v806_v0  ;;  %v79_v3 = vld [vmem:[#allocation7 + $0x8] sm:$0xff]  ;;  %v78_v4 = vld [vmem:[#allocation7] sm:$0xff]  ;;  %v72_v5 = vld [vmem:[#allocation2] sm:$0xff]  ;;  %vm158_vm1 = vcmask 130048   ;;  %vm84_vm2 = vcmask 261120   ;;  %s808_s19 = smov [#allocation10]  }
  0x35   :  { %634 = vmatprep.mubr.msk.f32.mxu1 %vm807_vm0, %v806_v0  ;;  %627 = vmatprep.mubr.msk.f32.mxu0 %vm807_vm0, %v806_v0  ;;  %v81_v6 = vld [vmem:[#allocation8 + $0x8] sm:$0xff]  ;;  %v250_v7 = vld [vmem:[#allocation8 + $0x38] sm:$0xff]  ;;  %v80_v8 = vld [vmem:[#allocation8] sm:$0xff]  ;;  %s572_s20 = sshll.u32 %s808_s19, 4  ;;  %s573_s20 = int_to_ptr.vmem [resolvable:$true] %s572_s20 }
  0x36   :  { %620 = vmatpush3.msra.mxu0 %v83_v1  ;;  %631 = vmatpush3.msra.mxu1 %v79_v3  ;;  %v861_v9 = vld [vmem:[#allocation5] sm:$0xff]  ;;  %v249_v10 = vld [vmem:[#allocation8 + $0x30] sm:$0xff]  ;;  %v247_v13 = vld [vmem:[#allocation8 + $0x20] sm:$0xff]  ;;  %p777_p7 = scmp.lt.s32.totalorder %s573_s20, %s573_s20 }
  0x37   :  { %621 = vmatprep.subr.mxu0 %v806_v0  ;;  %632 = vmatprep.subr.mxu1 %v806_v0  ;;  %v248_v11 = vld [vmem:[#allocation8 + $0x28] sm:$0xff]  ;;  %v244_v14 = vld [vmem:[#allocation7 + $0x10] sm:$0xff]  ;;  %v483_v15 = vld [vmem:[#allocation8 + $0x58] sm:$0xff] }
  0x38   :  { %622 = vmatpush3.msra.mxu0 %v82_v2  ;;  %633 = vmatpush3.msra.mxu1 %v78_v4  ;;  %v245_v12 = vld [vmem:[#allocation7 + $0x18] sm:$0xff]  ;;  %v404_v16 = vld [vmem:[#allocation7 + $0x28] sm:$0xff]  ;;  %v482_v17 = vld [vmem:[#allocation8 + $0x50] sm:$0xff] }
  0x39   :  { %623 = vmatprep.subr.mxu0 %v806_v0  ;;  %635 = vmatmul.mubr.msk.f32.vlgmr.msra.gmra.mxu1 %vm158_vm1, %v72_v5  ;;  %v403_v18 = vld [vmem:[#allocation7 + $0x20] sm:$0xff]  ;;  %v481_v19 = vld [vmem:[#allocation8 + $0x48] sm:$0xff]  ;;  %v480_v20 = vld [vmem:[#allocation8 + $0x40] sm:$0xff] }
  0x3a   :  { %624 = vmatpush3.msra.mxu0 %v81_v6  ;;  %637 = vmatprep.subr.mxu1 %v806_v0  ;;  %v585_v23 = vld [vmem:[%s913_s4] ss:$0 sm:$0xff]  ;;  %v589_v30 = vld [vmem:[%s913_s4 + $0x1] ss:$0 sm:$0xff]  ;;  %v593_v44 = vld [vmem:[%s913_s4 + $0x3] ss:$0 sm:$0xff] }
  0x3b   :  { %625 = vmatprep.subr.mxu0 %v806_v0  ;;  %638 = vmatpush3.msra.mxu1 %v250_v7  ;;  %v591_v46 = vld [vmem:[%s913_s4 + $0x2] ss:$0 sm:$0xff]  ;;  %s772_s4 = scalar_lea.vmem %s573_s20, 128 }
  0x3c   :  { %626 = vmatpush3.msra.mxu0 %v80_v8  ;;  %639 = vmatprep.subr.mxu1 %v806_v0  ;;  %p773_p6 = scmp.ne.s32.totalorder %s573_s20, %s772_s4  ;;  %p778_p8 = scmp.lt.s32.totalorder %s772_s4, %s772_s4 }
  0x3d   :  { %628 = vmatmul.mubr.msk.f32.vlgmr.msra.gmra.mxu0 %vm84_vm2, %v861_v9  ;;  %640 = vmatpush3.msra.mxu1 %v249_v10 }
  0x3e   :  { %641 = vmatprep.subr.mxu1 %v806_v0  ;;  %648 = vmatprep.subr.mxu0 %v806_v0  ;;  %p779_p9 = por %p778_p8, %p777_p7 }
  0x3f   :  { %642 = vmatpush3.msra.mxu1 %v248_v11  ;;  %649 = vmatpush3.msra.mxu0 %v245_v12 }
  0x40   :  { %643 = vmatprep.subr.mxu1 %v806_v0  ;;  %650 = vmatprep.subr.mxu0 %v806_v0  ;;  %p780_p10 = pnand %p779_p9, %p773_p6 }
  0x41   :  { %644 = vmatpush3.msra.mxu1 %v247_v13  ;;  %645 = vmatprep.mubr.msk.f32.mxu1 %vm807_vm0, %v806_v0 }
  0x42   :  { %651 = vmatpush3.msra.mxu0 %v244_v14  ;;  %652 = vmatprep.mubr.msk.f32.mxu0 %vm807_vm0, %v806_v0 }
  0x43   :  { %646 = vmatmul.mubr.msk.f32.vlgmr.msra.gmra.mxu1 %vm84_vm2, %v861_v9  ;;  %653 = vmatmul.mubr.msk.f32.vlgmr.msra.gmra.mxu0 %vm158_vm1, %v72_v5 }
  0x44   :  { %662 = vmatprep.subr.mxu1 %v806_v0  ;;  %655 = vmatprep.subr.mxu0 %v806_v0 }
  0x45   :  { %663 = vmatpush3.msra.mxu1 %v483_v15  ;;  %656 = vmatpush3.msra.mxu0 %v404_v16 }
  0x46   :  { %664 = vmatprep.subr.mxu1 %v806_v0  ;;  %670 = vmatprep.mubr.msk.f32.mxu1 %vm807_vm0, %v806_v0 }
  0x47   :  { %665 = vmatpush3.msra.mxu1 %v482_v17  ;;  %657 = vmatprep.subr.mxu0 %v806_v0 }
  0x48   :  { %666 = vmatprep.subr.mxu1 %v806_v0  ;;  %658 = vmatpush3.msra.mxu0 %v403_v18 }
  0x49   :  { %667 = vmatpush3.msra.mxu1 %v481_v19  ;;  %659 = vmatprep.mubr.msk.f32.mxu0 %vm807_vm0, %v806_v0 }
  0x4a   :  { %668 = vmatprep.subr.mxu1 %v806_v0  ;;  %660 = vmatmul.mubr.msk.f32.vlgmr.msra.gmra.mxu0 %vm158_vm1, %v72_v5 }
  0x4b   :  { %669 = vmatpush3.msra.mxu1 %v480_v20 }
  0x4c   :  { %671 = vmatmul.mubr.msk.f32.vlgmr.msra.gmra.mxu1 %vm84_vm2, %v861_v9 }
  0xf9   :  { %v228_v21 = vpop.f32.mrf.mxu1 }
  0xfb   :  { %v636_v22 = vpop.f32.mrf.mxu1 }
  0xfd   :  { %v154_v24 = vpop.f32.mrf.mxu0 }
  0xfe   :  { %v229_v25 = vadd.f32 %v228_v21, %v154_v24 }
  0xff   :  { %v629_v26 = vpop.f32.mrf.mxu0 }
 0x100   :  { %v236_v27 = vadd.f32 %v585_v23, %v229_v25 }
 0x102   :  { %v586_v28 = vmul.f32 -1.442695, %v236_v27 }
 0x103   :  { %v317_v29 = vpop.f32.mrf.mxu1  ;;  %v387_v31 = vpop.f32.mrf.mxu0 }
 0x104   :  { %682 = vpow2.f32 %v586_v28  ;;  %v388_v32 = vadd.f32 %v387_v31, %v317_v29 }
 0x105   :  { %v647_v33 = vpop.f32.mrf.mxu1  ;;  %v654_v34 = vpop.f32.mrf.mxu0 }
 0x106   :  { %v395_v35 = vadd.f32 %v589_v30, %v388_v32 }
 0x108   :  { %v590_v36 = vmul.f32 -1.442695, %v395_v35 }
 0x10a   :  { %v475_v37 = vpop.f32.mrf.mxu0  ;;  %684 = vpow2.f32 %v590_v36 }
 0x10b   :  { %v476_v48 = vadd.f32 %v591_v46, %v475_v37 }
 0x10c   :  { %v554_v38 = vpop.f32.mrf.mxu1  ;;  %v661_v39 = vpop.f32.mrf.mxu0 }
 0x10d   :  { %v555_v47 = vadd.f32 %v593_v44, %v554_v38 }
 0x10e   :  { %v672_v40 = vpop.f32.mrf.mxu1 }
 0x111   :  { %v683_v41 = vpop.eup %682 }
 0x112   :  { %v240_v42 = vadd.f32 1.0, %v683_v41 }
 0x114   :  { %686 = vrcp.f32 %v240_v42 }
 0x117   :  { %v685_v43 = vpop.eup %684 }
 0x118   :  { %v399_v45 = vadd.f32 1.0, %v685_v43 }
 0x11a   :  { %688 = vrcp.f32 %v399_v45 }
 0x121   :  { %v687_v49 = vpop.eup %686 }
 0x122   :  { %v558_v50 = vmul.f32 %v687_v49, %v555_v47 }
 0x124   :  { %v559_v51 = vadd.f32 %v558_v50, %v476_v48 }
 0x126   :  { %690 = vtanh.f32 %v559_v51 }
 0x127   :  { %v689_v52 = vpop.eup %688 }
 0x128   :  { %v561_v53 = vsub.f32 1.0, %v689_v52  ;;  %v563_v56 = vmul.f32 %v689_v52, %v861_v9 }
 0x133   :  { %v691_v54 = vpop.eup %690 }
 0x134   :  { %v562_v55 = vmul.f32 %v691_v54, %v561_v53 }
 0x136   :  { %v564_v57 = vadd.f32 %v563_v56, %v562_v55 }
 0x138   :  { %565 = vst.msk [vmem:[#allocation10] sm:$0xff] %vm84_vm2, %v564_v57 }
 0x139   :  { %783 = shalt.err (!%p780_p10)
}
 0x13a   :  { %575 = dma.vmem_to_hbm [thread:$0]  %s573_s20, 128, %s914_s5, [#allocation4]  }
 0x13b   :  { %798 = dma.done.wait [#allocation4], 128  }
 0x13c   :  { %799 = vsyncadd [#allocation4], 4294967168 }
 0x13d   :  { %579 = vsyncpa [#allocation3], 1 }
 0x13e   :  { %580 = vsyncpa [#allocation6], 1 }
 0x13f   :  { %581 = vsyncpa [#allocation9], 1 }
 0x140   :  { %582 = vsyncpa [#allocation4], 1 }

</bundles_post_ra>
